<compile_context>
chip_gen: v7x
topology: tpu7x:2x2x1
jax: 0.10.0
libtpu: 0.0.40
codegen_flags: <defaults>
</compile_context>

<pallas_src>
import jax
import jax.numpy as jnp
from jax import lax
from jax.experimental import pallas as pl
from jax.experimental.pallas import tpu as pltpu


# ----------------------------------------------------------------------------
# Per-generation blocking configuration.
# ----------------------------------------------------------------------------
def _tpu_config():
    try:
        kind = jax.devices()[0].device_kind.lower()
    except Exception:
        kind = ""
    if ("v5" in kind) or ("v6" in kind):
        # 128 MiB VMEM per TensorCore: bigger blocks, fewer grid steps.
        return dict(gemm_tile=2048, vmem_bytes=64 * 1024 * 1024,
                    row_cap=1024, min_grid=2)
    # v7x (64 MiB per TC, 2 TCs) and unknown chips: smaller blocks, even
    # grids with >= 2 steps per core.
    return dict(gemm_tile=1024, vmem_bytes=32 * 1024 * 1024,
                row_cap=512, min_grid=4)


_CFG = _tpu_config()


# ----------------------------------------------------------------------------
# Pallas kernel 1: transposed GEMM with fused per-output-channel scale/shift.
#   out[n, m] = (sum_k w[n, k] * a_t[k, m]) * scale[n] + shift[n]
# ----------------------------------------------------------------------------
def _matmul_bn_kernel(w_ref, at_ref, scale_ref, shift_ref, o_ref):
    acc = jnp.dot(w_ref[...], at_ref[...], preferred_element_type=jnp.float32)
    o_ref[...] = (acc * scale_ref[...] + shift_ref[...]).astype(o_ref.dtype)


def matmul_bn_t(w, a_t, scale=None, shift=None, out_dtype=jnp.bfloat16):
    """w: (N, K), a_t: (K, M) -> (N, M) in out_dtype, tiled over lane axis M."""
    N, K = w.shape
    Kb, M = a_t.shape
    assert K == Kb
    w = w.astype(jnp.bfloat16)          # MXU operand
    a_t = a_t.astype(jnp.bfloat16)      # MXU operand
    if scale is None:
        scale = jnp.ones((N,), jnp.float32)
    if shift is None:
        shift = jnp.zeros((N,), jnp.float32)
    scale = jnp.asarray(scale, jnp.float32).reshape(N, 1)
    shift = jnp.asarray(shift, jnp.float32).reshape(N, 1)

    # Lane tile over M: big enough to amortize per-step overhead, >= 2 grid
    # steps when possible so both v7x TensorCores get work.
    tm = min(_CFG['gemm_tile'], ((max(M, 2) // 2 + 127) // 128) * 128)
    tm = max(tm, 128)
    Mp = ((M + tm - 1) // tm) * tm
    if Mp != M:
        # TODO(synk): all shapes used here divide tm; keep the pad as a
        # fallback rather than a masked final tile.
        a_t = jnp.pad(a_t, ((0, 0), (0, Mp - M)))

    out = pl.pallas_call(
        _matmul_bn_kernel,
        out_shape=jax.ShapeDtypeStruct((N, Mp), out_dtype),
        grid=(Mp // tm,),
        in_specs=[
            pl.BlockSpec((N, K), lambda i: (0, 0)),
            pl.BlockSpec((K, tm), lambda i: (0, i)),
            pl.BlockSpec((N, 1), lambda i: (0, 0)),
            pl.BlockSpec((N, 1), lambda i: (0, 0)),
        ],
        out_specs=pl.BlockSpec((N, tm), lambda i: (0, i)),
        compiler_params=pltpu.CompilerParams(
            dimension_semantics=("parallel",),
            vmem_limit_bytes=_CFG['vmem_bytes']),
    )(w, a_t, scale, shift)
    return out[:, :M]


# ----------------------------------------------------------------------------
# Pallas kernel 2: positional axial attention for a block of rows.
# The similarity is kept transposed, sim_T[r, j, i] = similarity[r, i, j], so
# the softmax and the sve contraction reduce over the sublane axis (cheap) and
# both matmuls are standard leading-batch (nn) forms on the MXU.
# ----------------------------------------------------------------------------
def _axial_attention_kernel(q_ref, k_ref, v_ref, qe_ref, ket_ref, ve_ref,
                            sqk_ref, sqr_ref, skr_ref, ssh_ref,
                            osv_ref, osve_ref, osh_ref, out_ref):
    gpq = qe_ref.shape[0]
    gp = ve_ref.shape[0]
    G = sqk_ref.shape[0]

    qe = qe_ref[...]       # (gpq, Lj, Li)   qe[c, j, i] = q_embedding[c, i, j]
    ket = ket_ref[...]     # (gpq, Lj, Li)   ket[c, j, i] = k_embedding[c, j, i]
    ve = ve_ref[...]       # (gp,  Lj, Li)   ve[c, j, i] = v_embedding[c, i, j]
    sqk = sqk_ref[...]     # (G, 1, 1) folded bn_similarity scales (per group)
    sqr = sqr_ref[...]
    skr = skr_ref[...]
    ssh = ssh_ref[...]
    osv = osv_ref[...]     # (G, gp, 1) folded bn_output scales / shift
    osve = osve_ref[...]
    osh = osh_ref[...]

    for g in range(G):
        q_g = q_ref[:, g * gpq:(g + 1) * gpq, :]   # (R, gpq, Li) bf16
        k_g = k_ref[:, g * gpq:(g + 1) * gpq, :]   # (R, gpq, Lj) bf16
        v_g = v_ref[:, g * gp:(g + 1) * gp, :]     # (R, gp,  Lj) bf16

        # --- single fused similarity accumulator (transposed layout) ---
        if gpq == 1:
            qk_t = (k_g[:, 0, :].astype(jnp.float32)[:, :, None]
                    * q_g[:, 0, :].astype(jnp.float32)[:, None, :])
        else:
            # MXU: contract the channel dim -> (R, Lj, Li)
            qk_t = lax.dot_general(k_g, q_g, (((1,), (1,)), ((0,), (0,))),
                                   preferred_element_type=jnp.float32)
        sim = sqk[g] * qk_t + ssh[g]               # (R, Lj, Li) f32

        qs = q_g.astype(jnp.float32) * sqr[g]      # (R, gpq, Li)
        ks = k_g.astype(jnp.float32) * skr[g]      # (R, gpq, Lj)
        for c in range(gpq):
            sim = sim + qs[:, c, :][:, None, :] * qe[c][None]
            sim = sim + ks[:, c, :][:, :, None] * ket[c][None]

        # --- softmax over j == axis 1 (sublane axis) ---
        m = jnp.max(sim, axis=1, keepdims=True)
        e = jnp.exp(sim - m)
        den = jnp.sum(e, axis=1, keepdims=True)
        p = e * pl.reciprocal(den, approx=False)   # (R, Lj, Li) f32

        # --- value aggregation on the MXU: (R, gp, Lj) @ (R, Lj, Li) ---
        sv = lax.dot_general(v_g, p.astype(jnp.bfloat16),
                             (((2,), (1,)), ((0,), (0,))),
                             preferred_element_type=jnp.float32)  # (R, gp, Li)

        # --- positional value aggregation (sublane-axis contraction) ---
        sve = jnp.stack(
            [jnp.sum(p * ve[c][None], axis=1) for c in range(gp)],
            axis=1)                                               # (R, gp, Li)

        # --- folded bn_output epilogue + interleaved-channel sum ---
        out_g = osv[g] * sv + osve[g] * sve + osh[g]
        out_ref[:, g * gp:(g + 1) * gp, :] = out_g.astype(out_ref.dtype)


# ----------------------------------------------------------------------------
# JAX glue: BN folding, im2col convs, axial attention wrapper, blocks.
# ----------------------------------------------------------------------------
def bn_fold(bnp, eps=1e-5):
    gamma, beta, mean, var = bnp
    scale = gamma / jnp.sqrt(var + eps)
    shift = beta - mean * scale
    return scale, shift


def im2col_t(x, kh, kw, stride, padding):
    """x: (N, C, H, W) -> (C*kh*kw, N*Ho*Wo) patch matrix (cols = out pixels)."""
    N, C, H, W = x.shape
    xp = jnp.pad(x, ((0, 0), (0, 0), (padding, padding), (padding, padding)))
    Ho = (H + 2 * padding - kh) // stride + 1
    Wo = (W + 2 * padding - kw) // stride + 1
    cols = []
    for i in range(kh):
        for j in range(kw):
            cols.append(xp[:, :, i:i + stride * Ho:stride, j:j + stride * Wo:stride])
    patches = jnp.stack(cols, axis=2).reshape(N, C * kh * kw, Ho, Wo)
    a_t = patches.transpose(1, 0, 2, 3).reshape(C * kh * kw, N * Ho * Wo)
    return a_t, Ho, Wo


def conv2d(x, w, stride=1, padding=0, bn=None, bias=None,
           out_dtype=jnp.bfloat16):
    """NCHW conv as (bf16) im2col + transposed Pallas GEMM with fused BN/bias."""
    N, C, H, W = x.shape
    Cout, Cin, kh, kw = w.shape
    assert Cin == C
    a_t, Ho, Wo = im2col_t(x.astype(jnp.bfloat16), kh, kw, stride, padding)
    wmat = w.reshape(Cout, Cin * kh * kw)
    if bn is not None:
        scale, shift = bn_fold(bn)
    else:
        scale = None
        shift = None if bias is None else jnp.asarray(bias, jnp.float32)
    y = matmul_bn_t(wmat, a_t, scale, shift, out_dtype=out_dtype)
    return y.reshape(Cout, N, Ho, Wo).transpose(1, 0, 2, 3)


def conv1x1(x, w, bn=None, stride=1, out_dtype=jnp.bfloat16):
    if stride > 1:
        x = x[:, :, ::stride, ::stride]
    N, C, H, W = x.shape
    Cout = w.shape[0]
    a_t = x.astype(jnp.bfloat16).transpose(1, 0, 2, 3).reshape(C, N * H * W)
    scale, shift = (bn_fold(bn) if bn is not None else (None, None))
    y = matmul_bn_t(w, a_t, scale, shift, out_dtype=out_dtype)
    return y.reshape(Cout, N, H, W).transpose(1, 0, 2, 3)


def gelu(x):
    return jax.nn.gelu(x.astype(jnp.float32), approximate=False).astype(x.dtype)


def axial_attention(x, ap, kernel_size, groups, stride=1, width_axis=False):
    """Positional axial attention along H (width_axis=False) or W (True)."""
    N, C, H, W = x.shape
    out_planes = ap['out_planes']
    gp = out_planes // groups
    gpq = gp // 2
    L = kernel_size

    if width_axis:
        a_t = x.transpose(1, 0, 2, 3).reshape(C, N * H * W)  # cols (n, h, w)
        B = N * H
    else:
        a_t = x.transpose(1, 0, 3, 2).reshape(C, N * W * H)  # cols (n, w, h)
        B = N * W
    assert a_t.shape[1] == B * L

    # qkv projection (1x1 conv1d) + folded bn_qkv -> transposed Pallas GEMM
    q_scale, q_shift = bn_fold(ap['bn_qkv'])
    qkv = matmul_bn_t(ap['w_qkv'], a_t, q_scale, q_shift,
                      out_dtype=jnp.bfloat16)                 # (2*op, B*L)
    qkv = qkv.reshape(groups, 2 * gp, B, L)
    q = qkv[:, :gpq].transpose(2, 0, 1, 3).reshape(B, groups * gpq, L)
    k = qkv[:, gpq:2 * gpq].transpose(2, 0, 1, 3).reshape(B, groups * gpq, L)
    v = qkv[:, 2 * gpq:].transpose(2, 0, 1, 3).reshape(B, groups * gp, L)

    # relative positional embeddings: all_emb[c, i, j] = relative[c, i - j + L - 1]
    idx = jnp.arange(L)[:, None] - jnp.arange(L)[None, :] + (L - 1)
    all_emb = ap['relative'][:, idx].astype(jnp.float32)      # (2*gp, L, L)
    qe_t = jnp.transpose(all_emb[:gpq], (0, 2, 1))            # [c, j, i] = q_emb[c, i, j]
    ket_t = all_emb[gpq:2 * gpq]                              # [c, j, i] = k_emb[c, j, i]
    ve_t = jnp.transpose(all_emb[2 * gpq:], (0, 2, 1))        # [c, j, i] = v_emb[c, i, j]

    # folded eval-mode bn_similarity (channel order: [qk | qr | kr] x groups)
    s_scale, s_shift = bn_fold(ap['bn_sim'])
    sqk = s_scale[:groups].reshape(groups, 1, 1)
    sqr = s_scale[groups:2 * groups].reshape(groups, 1, 1)
    skr = s_scale[2 * groups:].reshape(groups, 1, 1)
    ssh = (s_shift[:groups] + s_shift[groups:2 * groups]
           + s_shift[2 * groups:]).reshape(groups, 1, 1)

    # folded eval-mode bn_output (channel index = g*gp*2 + c*2 + {0:sv, 1:sve})
    o_scale, o_shift = bn_fold(ap['bn_out'])
    o_scale = o_scale.reshape(groups, gp, 2)
    o_shift = o_shift.reshape(groups, gp, 2)
    osv = o_scale[..., 0][..., None]
    osve = o_scale[..., 1][..., None]
    osh = (o_shift[..., 0] + o_shift[..., 1])[..., None]

    # Row blocking: per-generation cap, grid kept >= min_grid steps.
    rows = max(1, min(_CFG['row_cap'] // max(L, 1),
                      max(1, B // _CFG['min_grid'])))
    while rows > 1 and B % rows != 0:
        rows -= 1

    row_q = pl.BlockSpec((rows, groups * gpq, L), lambda b: (b, 0, 0))
    row_v = pl.BlockSpec((rows, groups * gp, L), lambda b: (b, 0, 0))
    out_spec = pl.BlockSpec((rows, groups * gp, L), lambda b: (b, 0, 0))
    const3 = lambda shape: pl.BlockSpec(shape, lambda b: (0, 0, 0))

    out = pl.pallas_call(
        _axial_attention_kernel,
        out_shape=jax.ShapeDtypeStruct((B, groups * gp, L), jnp.bfloat16),
        grid=(B // rows,),
        in_specs=[
            row_q, row_q, row_v,
            const3((gpq, L, L)), const3((gpq, L, L)), const3((gp, L, L)),
            const3((groups, 1, 1)), const3((groups, 1, 1)),
            const3((groups, 1, 1)), const3((groups, 1, 1)),
            const3((groups, gp, 1)), const3((groups, gp, 1)),
            const3((groups, gp, 1)),
        ],
        out_specs=out_spec,
        compiler_params=pltpu.CompilerParams(
            dimension_semantics=("parallel",),
            vmem_limit_bytes=_CFG['vmem_bytes']),
    )(q, k, v, qe_t, ket_t, ve_t, sqk, sqr, skr, ssh, osv, osve, osh)

    out = out.reshape(N, B // N, out_planes, L)
    if width_axis:
        out = out.transpose(0, 2, 1, 3)       # (N, C, H, W)
    else:
        out = out.transpose(0, 2, 3, 1)       # (N, C, H, W)
    if stride > 1:                            # AvgPool2d(stride, stride)
        n2, c2, h2, w2 = out.shape
        out = out.reshape(n2, c2, h2 // stride, stride,
                          w2 // stride, stride).mean(axis=(3, 5))
    return out


def axial_block(x, bp, groups):
    """Positional AxialBlock (expansion = 2)."""
    stride = bp['stride']
    ks = bp['kernel_size']
    identity = x
    out = conv1x1(x, bp['w_down'], bn=bp['bn1'])
    out = jax.nn.relu(out)
    out = axial_attention(out, bp['h_attn'], ks, groups, stride=1, width_axis=False)
    out = axial_attention(out, bp['w_attn'], ks, groups, stride=stride, width_axis=True)
    out = jax.nn.relu(out)
    out = conv1x1(out, bp['w_up'], bn=bp['bn2'])
    if bp['downsample'] is not None:
        wd, bnd = bp['downsample']
        identity = conv1x1(identity, wd, bn=bnd, stride=stride)
    out = out + identity
    return jax.nn.relu(out)


# ----------------------------------------------------------------------------
# Parameter initialization (deterministic, PRNGKey-based).
# ----------------------------------------------------------------------------
def init_params(key, *, s=0.125, img_size=128, imgchan=1, num_classes=2,
                groups=8, base_width=64, layers=(1, 1, 1, 1)):
    keys = iter(jax.random.split(key, 512))

    def nrm(shape, scale=0.1):
        return (scale * jax.random.normal(next(keys), shape)).astype(jnp.float32)

    def bn(c):  # (gamma, beta, running_mean, running_var)
        return (1.0 + 0.1 * jax.random.normal(next(keys), (c,)).astype(jnp.float32),
                0.1 * jax.random.normal(next(keys), (c,)).astype(jnp.float32),
                jnp.zeros((c,), jnp.float32),
                jnp.ones((c,), jnp.float32))

    inplanes = int(64 * s)
    P = {'groups': groups}
    P['conv1'] = nrm((inplanes, imgchan, 7, 7))
    P['bn1'] = bn(inplanes)
    P['conv2'] = nrm((128, inplanes, 3, 3))
    P['bn2'] = bn(128)
    P['conv3'] = nrm((inplanes, 128, 3, 3))
    P['bn3'] = bn(inplanes)

    def attn_params(in_planes, out_planes, ks):
        gp = out_planes // groups
        return {'out_planes': out_planes,
                'w_qkv': nrm((2 * out_planes, in_planes)),
                'bn_qkv': bn(2 * out_planes),
                'bn_sim': bn(3 * groups),
                'bn_out': bn(2 * out_planes),
                'relative': nrm((2 * gp, 2 * ks - 1))}

    def make_layer(planes, blocks, ks, stride):
        nonlocal inplanes
        layer = []
        for bi in range(blocks):
            st = stride if bi == 0 else 1
            width = int(planes * (base_width / 64.0))
            bp = {'w_down': nrm((width, inplanes)),
                  'bn1': bn(width),
                  'h_attn': attn_params(width, width, ks),
                  'w_attn': attn_params(width, width, ks),
                  'w_up': nrm((planes * 2, width)),
                  'bn2': bn(planes * 2),
                  'stride': st,
                  'kernel_size': ks}
            if st != 1 or inplanes != planes * 2:
                bp['downsample'] = (nrm((planes * 2, inplanes)), bn(planes * 2))
            else:
                bp['downsample'] = None
            layer.append(bp)
            inplanes = planes * 2
            if bi == 0 and stride != 1:
                ks = ks // 2
        return layer

    P['layer1'] = make_layer(int(128 * s), layers[0], img_size // 2, 1)
    P['layer2'] = make_layer(int(256 * s), layers[1], img_size // 2, 2)
    P['layer3'] = make_layer(int(512 * s), layers[2], img_size // 4, 2)
    P['layer4'] = make_layer(int(1024 * s), layers[3], img_size // 8, 2)
    P['adjust_w'] = nrm((num_classes, int(2048 * s), 7, 7))
    P['adjust_b'] = nrm((num_classes,))
    return P


def forward(P, x):
    groups = P['groups']
    x = conv2d(x, P['conv1'], stride=2, padding=3, bn=P['bn1'])
    x = gelu(x)
    x = conv2d(x, P['conv2'], stride=1, padding=1, bn=P['bn2'])
    x = gelu(x)
    x = conv2d(x, P['conv3'], stride=1, padding=1, bn=P['bn3'])
    x = gelu(x)
    for lname in ('layer1', 'layer2', 'layer3', 'layer4'):
        for bp in P[lname]:
            x = axial_block(x, bp, groups)
    x = gelu(x)
    x = conv2d(x, P['adjust_w'], stride=2, padding=0, bias=P['adjust_b'],
               out_dtype=jnp.float32)
    return x


if __name__ == "__main__":
    key = jax.random.PRNGKey(0)
    pkey, xkey = jax.random.split(key)
    params = init_params(pkey, s=0.125, img_size=128, imgchan=1,
                         num_classes=2, groups=8, layers=(1, 1, 1, 1))
    x = jax.random.normal(xkey, (2, 1, 128, 128), jnp.float32)
    y = forward(params, x)
    y = jax.block_until_ready(y)
    assert y.shape == (2, 2, 1, 1), y.shape
    assert bool(jnp.all(jnp.isfinite(y)))
    print("KERNEL_OK")
</pallas_src>

<mosaic_0001>
module attributes {stable_mosaic.version = 11 : i64} {
  func.func @_matmul_bn_kernel(%arg0: i32, %arg1: memref<8x49xbf16, #tpu.memory_space<vmem>>, %arg2: memref<49x1024xbf16, #tpu.memory_space<vmem>>, %arg3: memref<8x1xf32, #tpu.memory_space<vmem>>, %arg4: memref<8x1xf32, #tpu.memory_space<vmem>>, %arg5: memref<8x1024xbf16, #tpu.memory_space<vmem>>) attributes {dimension_semantics = [#tpu.dimension_semantics<parallel>], iteration_bounds = array<i64: 8>, scalar_prefetch = 0 : i64, scratch_operands = 0 : i64, tpu.core_type = #tpu.core_type<tc>, window_params = [{pipeline_mode = #tpu.pipeline_mode<synchronous>, transform_indices = @transform_0, window_bounds = array<i64: 8, 49>}, {transform_indices = @transform_1, window_bounds = array<i64: 49, 1024>}, {pipeline_mode = #tpu.pipeline_mode<synchronous>, transform_indices = @transform_2, window_bounds = array<i64: 8, 1>}, {pipeline_mode = #tpu.pipeline_mode<synchronous>, transform_indices = @transform_3, window_bounds = array<i64: 8, 1>}, {transform_indices = @transform_4, window_bounds = array<i64: 8, 1024>}]} {
    %c0 = arith.constant 0 : index
    %c0_0 = arith.constant 0 : index
    %0 = vector.load %arg1[%c0, %c0_0] : memref<8x49xbf16, #tpu.memory_space<vmem>>, vector<8x49xbf16>
    %c0_1 = arith.constant 0 : index
    %c0_2 = arith.constant 0 : index
    %1 = vector.load %arg2[%c0_1, %c0_2] : memref<49x1024xbf16, #tpu.memory_space<vmem>>, vector<49x1024xbf16>
    %cst = arith.constant dense<0.000000e+00> : vector<8x1024xf32>
    %2 = tpu.matmul %0, %1, %cst {dimension_numbers = #tpu.dot_dimension_numbers<[1], [0], [0], [1], [0, 0, 1, 1], [], []>} : vector<8x49xbf16>, vector<49x1024xbf16>, vector<8x1024xf32> -> vector<8x1024xf32>
    %c0_3 = arith.constant 0 : index
    %c0_4 = arith.constant 0 : index
    %3 = vector.load %arg3[%c0_3, %c0_4] : memref<8x1xf32, #tpu.memory_space<vmem>>, vector<8x1xf32>
    %4 = vector.broadcast %3 : vector<8x1xf32> to vector<8x1024xf32>
    %5 = arith.mulf %2, %4 : vector<8x1024xf32>
    %c0_5 = arith.constant 0 : index
    %c0_6 = arith.constant 0 : index
    %6 = vector.load %arg4[%c0_5, %c0_6] : memref<8x1xf32, #tpu.memory_space<vmem>>, vector<8x1xf32>
    %7 = vector.broadcast %6 : vector<8x1xf32> to vector<8x1024xf32>
    %8 = arith.addf %5, %7 : vector<8x1024xf32>
    %9 = arith.truncf %8 : vector<8x1024xf32> to vector<8x1024xbf16>
    %c0_7 = arith.constant 0 : index
    %c0_8 = arith.constant 0 : index
    %10 = vector.load %arg5[%c0_7, %c0_8] : memref<8x1024xbf16, #tpu.memory_space<vmem>>, vector<8x1024xbf16>
    tpu.vector_store %arg5[%c0_7, %c0_8], %9 {strides = array<i32>} : memref<8x1024xbf16, #tpu.memory_space<vmem>>, vector<8x1024xbf16>,
    return
  }
  func.func @transform_0(%arg0: i32) -> (i32, i32) {
    %c0_i32 = arith.constant 0 : i32
    %c0_i32_0 = arith.constant 0 : i32
    %c0_i32_1 = arith.constant 0 : i32
    return %c0_i32, %c0_i32_0 : i32, i32
  }
  func.func @transform_1(%arg0: i32) -> (i32, i32) {
    %c0_i32 = arith.constant 0 : i32
    %c0_i32_0 = arith.constant 0 : i32
    return %c0_i32, %arg0 : i32, i32
  }
  func.func @transform_2(%arg0: i32) -> (i32, i32) {
    %c0_i32 = arith.constant 0 : i32
    %c0_i32_0 = arith.constant 0 : i32
    %c0_i32_1 = arith.constant 0 : i32
    return %c0_i32, %c0_i32_0 : i32, i32
  }
  func.func @transform_3(%arg0: i32) -> (i32, i32) {
    %c0_i32 = arith.constant 0 : i32
    %c0_i32_0 = arith.constant 0 : i32
    %c0_i32_1 = arith.constant 0 : i32
    return %c0_i32, %c0_i32_0 : i32, i32
  }
  func.func @transform_4(%arg0: i32) -> (i32, i32) {
    %c0_i32 = arith.constant 0 : i32
    %c0_i32_0 = arith.constant 0 : i32
    return %c0_i32, %arg0 : i32, i32
  }
}

</mosaic_0001>

<bundles_post_ra>
// kernel: tpu_custom_call.1
= control target key start
LH: loop header
LB: loop body
LE: loop exit
PB: predicated region body
PF: predicated region fallthrough
CT: control target
= control target key end

     0   :  { %9 = vsyncpa [#allocation3], 0  ;;  %s1194_s0 = inlined_call_operand.vmem [shape: bf16[8,49], index: 0, kind: input, shape index: {}]   ;;  %s1195_s1 = inlined_call_operand.hbm [shape: bf16[49,8192], index: 1, kind: input, shape index: {}]   ;;  %s1196_s2 = inlined_call_operand.vmem [shape: f32[8,1], index: 2, kind: input, shape index: {}]   ;;  %s1197_s3 = inlined_call_operand.vmem [shape: f32[8,1], index: 3, kind: input, shape index: {}]   ;;  %s1198_s4 = inlined_call_operand.hbm [shape: bf16[8,8192], index: 4, kind: output, shape index: {}]  }
   0x1   :  { %11 = vsyncpa [#allocation3 + $0x1], 0 }
   0x2   :  { %12 = vsyncpa [#allocation4], 0 }
   0x3   :  { %14 = vsyncpa [#allocation4 + $0x1], 0  ;;  %s980_s15 = smov 0   ;;  %s982_s16 = smov 0  }
   0x4   :  { %s984_s17 = smov 0   ;;  %s986_s18 = smov 0  }
   0x5 LB: > { %s1001_s19 = sadd.s32 4294967295, %s947_s18   ;;  %s732_s20 = sadd.s32 4294967294, %s947_s18   ;;  %s947_s18 = sphi %s986_s18, %s1210_s18   ;;  %s943_s17 = sphi %s984_s17, %s1209_s17   ;;  %s939_s16 = sphi %s982_s16, %s1208_s16   ;;  %s935_s15 = sphi %s980_s15, %s1207_s15  }
   0x6   : > { %s1005_s21 = sadd.s32 1, %s947_s18   ;;  %s48_s22 = sadd.s32 1, %s943_s17 }
   0x7   : > { %s45_s23 = ssub.s32 %s947_s18, %s1005_s21  ;;  %p55_p0 = scmp.ne.s32.totalorder %s943_s17, %s939_s16 }
   0x8   : > { %p46_p1 = scmp.eq.s32.totalorder %s45_s23, 0  ;;  %p56_p2 = scmp.eq.s32.totalorder %s947_s18, 0 }
   0x9   : > { %p61_p3 = scmp.ne.s32.totalorder %s939_s16, %s935_s15  ;;  %p62_p4 = scmp.eq.s32.totalorder %s1001_s19, 0 }
   0xa   : > { %s1017_s24 = scalar_select %p46_p1, %s943_s17, %s48_s22  }
   0xb   : > { %p57_p5 = por %p56_p2, %p55_p0  ;;  %p1019_p6 = por %p62_p4, %p61_p3 }
   0xc   : > { %p127_p7 = scmp.eq.s32.totalorder %s1001_s19, 7  ;;  %p133_p8 = scmp.eq.s32.totalorder %s732_s20, 7 }
   0xd   : > { %p804_p9 = scmp.lt.s32.totalorder %s947_s18, 8  ;;  %s162_s28 = sand.u32 1, %s943_s17  }
   0xe   : > { %p1025_p10 = por %p127_p7, %p55_p0  ;;  %p1029_p11 = por %p133_p8, %p61_p3 }
   0xf   : > { %s784_s29 = sshll.u32 %s947_s18, 9  ;;  %s790_s30 = smul.u32 224, %s162_s28 }
  0x10   : > { %s1201_s26 = scalar_select %p1025_p10, 1, 0 }
  0x11   : > { %s1202_s27 = scalar_select %p1029_p11, 1, 0 }
  0x12   : > { %s1038_s7 = scalar_lea.hbm %s1195_s1, %s784_s29  ;;  %p1040_p12 = pnand %p804_p9, %p57_p5 }
  0x13   : > { %s166_s9 = scalar_lea.vmem [#allocation2], %s790_s30  ;;  %s1047_s11 = scalar_lea.sflag [#allocation3], %s162_s28 }
  0x14   : > { %s173_s10 = sshll.u32 %s166_s9, 4  ;;  %s851_s12 = scalar_lea.hbm %s1038_s7, 3584  ;;  %s1044_s10 = int_to_ptr.vmem [resolvable:$true] %s173_s10 }
  0x15   : > { %p852_p0 = scmp.ne.s32.totalorder %s1038_s7, %s851_s12  ;;  %p853_p1 = pneg %p1040_p12 }
  0x16   : > { %s856_s20 = scalar_lea.hbm %s1195_s1, 28672  ;;  %p857_p4 = scmp.lt.u32.totalorder %s1038_s7, %s1195_s1 }
  0x17   : > { %p854_p2 = pnand %p853_p1, %p852_p0  ;;  %p858_p5 = scmp.lt.u32.totalorder %s856_s20, %s851_s12 }
  0x18   : > { %p860_p8 = scmp.lt.u32.totalorder %s851_s12, %s1038_s7 }
  0x19   : > { %p855_p3 = pneg %p854_p2  ;;  %p859_p7 = por %p858_p5, %p857_p4 }
  0x1b   : > { %p861_p9 = por %p860_p8, %p859_p7 }
  0x1d   : > { %p862_p13 = pnand %p861_p9, %p855_p3 }
  0x1f   : > { %865 = shalt.err (!%p862_p13)
}
  0x20   : > { %s866_s28 = scalar_lea.vmem %s1044_s10, 3584  ;;  %s949_s29 = smov [#allocation2]  }
  0x21   : > { %p867_p0 = scmp.ne.s32.totalorder %s1044_s10, %s866_s28  ;;  %s871_s30 = sshll.u32 %s949_s29, 4  ;;  %s872_s30 = int_to_ptr.vmem [resolvable:$false] %s871_s30 }
  0x22   : > { %s873_s5 = scalar_lea.vmem %s872_s30, 7168  ;;  %p874_p10 = scmp.lt.s32.totalorder %s1044_s10, %s872_s30 }
  0x23   : > { %p869_p2 = pnand %p867_p0, %p853_p1  ;;  %p875_p4 = scmp.lt.s32.totalorder %s873_s5, %s866_s28 }
  0x25   : > { %p870_p11 = pneg %p869_p2  ;;  %p876_p5 = por %p875_p4, %p874_p10 }
  0x27   : > { %p877_p7 = pnand %p876_p5, %p870_p11 }
  0x29   : > { %880 = shalt.err (!%p877_p7)
}
  0x2a   : > { %s950_s6 = smov 4096   ;;  %s951_s9 = smov 512  }
  0x2b   : > { %s952_s12 = smov 32   ;;  %p181_p13 = scmp.lt.s32.totalorder %s947_s18, 9 }
  0x2c   : > { %799 = dma.hbm_to_vmem [thread:$0]  (!%p1040_p12), %s1038_s7, 3584, %s1044_s10, %s1047_s11, %s950_s6, %s951_s9, %s952_s12  }
  0x2d   : > { %p1204_p1 = scmp.ge.s32.totalorder %s947_s18, 1 }
  0x2f   : > { %p182_p3 = pnand %p1204_p1, %p181_p13 }
  0x30   : > { %s1079_s13 = sand.u32 (!%p182_p3), 1, %s939_s16  }
  0x31   : > { %185 = sbr.rel (%p182_p3) target bundleno = 326 (0x146), region = 36  ;;  %s188_s20 = scalar_lea.sflag (!%p182_p3), [#allocation3], %s1079_s13 }
  0x32   : > { %s791_s14 = smul.u32 (!%p182_p3), 224, %s1079_s13 }
  0x34   : > { %s1083_s22 = scalar_lea.vmem (!%p182_p3), [#allocation2], %s791_s14 }
  0x38   : > { %926 = dma.done.wait (%p1019_p6), %s188_s20, 3584  }
  0x39   : > { %928 = vsyncadd (%p1019_p6), %s188_s20, 4294963712  ;;  %v953_v0 = vmov 0   ;;  %v220_v1 = vld [vmem:[%s1083_s22] sm:$0xff]  ;;  %v221_v3 = vld [vmem:[%s1083_s22 + $0x8] sm:$0xff]  ;;  %vm392_vm0 = vcmask 1040384   ;;  %vm388_vm1 = vcmask 400384  }
  0x3a   : > { %451 = vmatprep.mubr.bf16.mxu0 %v953_v0  ;;  %492 = vmatprep.mubr.bf16.mxu1 %v953_v0  ;;  %v224_v2 = vld [vmem:[%s1083_s22 + $0x20] sm:$0xff]  ;;  %v225_v5 = vld [vmem:[%s1083_s22 + $0x28] sm:$0xff]  ;;  %v1107_v26 = vsel %vm392_vm0, 65535, %v953_v0  ;;  %v222_v35 = vld [vmem:[%s1083_s22 + $0x10] sm:$0xff]  ;;  %s738_s28 = sshll.u32 %s1079_s13, 5  ;;  %s789_s30 = sshll.u32 %s1001_s19, 9 }
  0x3b   : > { %842 = vset.pattern.permute.xlu0 %v953_v0  ;;  %v740_v4 = vcombine.high %v220_v1, %v224_v2  ;;  %v739_v6 = vcombine.low %v220_v1, %v224_v2  ;;  %v228_v7 = vld [vmem:[%s1083_s22 + $0x40] sm:$0xff]  ;;  %v742_v9 = vcombine.high %v221_v3, %v225_v5  ;;  %v741_v10 = vcombine.low %v221_v3, %v225_v5  ;;  %v229_v12 = vld [vmem:[%s1083_s22 + $0x48] sm:$0xff]  ;;  %v226_v36 = vld [vmem:[%s1083_s22 + $0x30] sm:$0xff]  ;;  %s215_s29 = scalar_lea.vmem [#allocation5], %s738_s28  ;;  %s1151_s12 = scalar_lea.hbm %s1198_s4, %s789_s30 }
  0x3c   : > { %v232_v8 = vld [vmem:[%s1083_s22 + $0x60] sm:$0xff]  ;;  %v233_v13 = vld [vmem:[%s1083_s22 + $0x68] sm:$0xff]  ;;  %v223_v37 = vld [vmem:[%s1083_s22 + $0x18] sm:$0xff]  ;;  %v744_v42 = vcombine.high %v222_v35, %v226_v36  ;;  %v743_v49 = vcombine.low %v222_v35, %v226_v36  ;;  %s662_s5 = sshll.u32 %s215_s29, 4  ;;  %s648_s14 = scalar_lea.sflag [#allocation4], %s1079_s13  ;;  %s1153_s5 = int_to_ptr.vmem [resolvable:$true] %s662_s5 }
  0x3d   : > { %v748_v11 = vcombine.high %v228_v7, %v232_v8  ;;  %v236_v14 = vld [vmem:[%s1083_s22 + $0x80] sm:$0xff]  ;;  %419 = vmatprep.subr.bf16.mxu0 %v740_v4  ;;  %v750_v15 = vcombine.high %v229_v12, %v233_v13  ;;  %v237_v17 = vld [vmem:[%s1083_s22 + $0x88] sm:$0xff]  ;;  %460 = vmatprep.subr.bf16.mxu1 %v742_v9  ;;  %v747_v19 = vcombine.low %v228_v7, %v232_v8  ;;  %v227_v38 = vld [vmem:[%s1083_s22 + $0x38] sm:$0xff]  ;;  %s881_s20 = scalar_lea.vmem %s1153_s5, 512  ;;  %p1205_p10 = scmp.ne.s32.totalorder %s1201_s26, 0 }
  0x3e   : > { %v240_v16 = vld [vmem:[%s1083_s22 + $0xa0] sm:$0xff]  ;;  %v241_v18 = vld [vmem:[%s1083_s22 + $0xa8] sm:$0xff]  ;;  %420 = vmatpush1.bf16.msra.mxu0 %v739_v6  ;;  %461 = vmatpush1.bf16.msra.mxu1 %v741_v10  ;;  %v749_v22 = vcombine.low %v229_v12, %v233_v13  ;;  %v746_v43 = vcombine.high %v223_v37, %v227_v38  ;;  %v230_v44 = vld [vmem:[%s1083_s22 + $0x50] sm:$0xff]  ;;  %v745_v50 = vcombine.low %v223_v37, %v227_v38  ;;  %p882_p6 = scmp.ne.s32.totalorder %s1153_s5, %s881_s20  ;;  %s954_s19 = smov [#allocation5]  }
  0x3f   : > { %v244_v20 = vld [vmem:[%s1083_s22 + $0xc0] sm:$0x11]  ;;  %v245_v21 = vld [vmem:[%s1083_s22 + $0xc8] sm:$0x11]  ;;  %421 = vmatprep.subr.bf16.mxu0 %v748_v11  ;;  %v756_v23 = vcombine.high %v236_v14, %v240_v16  ;;  %462 = vmatprep.subr.bf16.mxu1 %v750_v15  ;;  %v758_v25 = vcombine.high %v237_v17, %v241_v18  ;;  %v755_v28 = vcombine.low %v236_v14, %v240_v16  ;;  %v234_v45 = vld [vmem:[%s1083_s22 + $0x70] sm:$0xff] }
  0x40   : > { %v764_v24 = vcombine.high %v244_v20, %v244_v20  ;;  %v766_v27 = vcombine.high %v245_v21, %v245_v21  ;;  %v763_v29 = vcombine.low %v244_v20, %v244_v20  ;;  %v757_v30 = vcombine.low %v237_v17, %v241_v18  ;;  %v583_v33 = vld [vmem:[%s1196_s2] sm:$0xff]  ;;  %v231_v46 = vld [vmem:[%s1083_s22 + $0x58] sm:$0xff]  ;;  %v238_v53 = vld [vmem:[%s1083_s22 + $0x90] sm:$0xff]  ;;  %p883_p11 = pnand %p882_p6, %p1205_p10 }
  0x41   : > { %v765_v32 = vcombine.low %v245_v21, %v245_v21  ;;  %586 = vperm.xlu0 %842, %v583_v33   ;;  %v597_v40 = vld [vmem:[%s1197_s3] sm:$0xff]  ;;  %v235_v47 = vld [vmem:[%s1083_s22 + $0x78] sm:$0xff]  ;;  %v752_v51 = vcombine.high %v230_v44, %v234_v45  ;;  %v242_v54 = vld [vmem:[%s1083_s22 + $0xb0] sm:$0xff]  ;;  %v751_v59 = vcombine.low %v230_v44, %v234_v45 }
  0x42   : > { %422 = vmatpush1.bf16.msra.mxu0 %v747_v19  ;;  %463 = vmatpush1.bf16.msra.mxu1 %v749_v22  ;;  %v399_v31 = vand.u32 %v764_v24, %v1107_v26  ;;  %v405_v34 = vand.u32 %v766_v27, %v1107_v26  ;;  %v396_v39 = vand.u32 %v763_v29, %v1107_v26  ;;  %v219_v48 = vld [vmem:[%s1194_s0] sm:$0xf]  ;;  %v246_v55 = vld [vmem:[%s1083_s22 + $0xd0] sm:$0x11]  ;;  %v239_v56 = vld [vmem:[%s1083_s22 + $0x98] sm:$0xff]  ;;  %p884_p12 = pneg %p883_p11 }
  0x43   : > { %423 = vmatprep.subr.bf16.mxu0 %v756_v23  ;;  %464 = vmatprep.subr.bf16.mxu1 %v758_v25  ;;  %v402_v41 = vand.u32 %v765_v32, %v1107_v26  ;;  %v754_v52 = vcombine.high %v231_v46, %v235_v47  ;;  %v243_v57 = vld [vmem:[%s1083_s22 + $0xb8] sm:$0xff]  ;;  %v753_v60 = vcombine.low %v231_v46, %v235_v47 }
  0x44   : > { %v247_v58 = vld [vmem:[%s1083_s22 + $0xd8] sm:$0x11]  ;;  %v760_v61 = vcombine.high %v238_v53, %v242_v54  ;;  %v768_v62 = vcombine.high %v246_v55, %v246_v55  ;;  %v762_v63 = vcombine.high %v239_v56, %v243_v57  ;;  %v759_v2 = vcombine.low %v238_v53, %v242_v54  ;;  %s885_s22 = sshll.u32 %s954_s19, 4  ;;  %s886_s22 = int_to_ptr.vmem [resolvable:$false] %s885_s22 }
  0x45   : > { %600 = vperm.xlu0 %842, %v597_v40   ;;  %v770_v1 = vcombine.high %v247_v58, %v247_v58  ;;  %v767_v3 = vcombine.low %v246_v55, %v246_v55  ;;  %v761_v4 = vcombine.low %v239_v56, %v243_v57  ;;  %v769_v6 = vcombine.low %v247_v58, %v247_v58  ;;  %s887_s25 = scalar_lea.vmem %s886_s22, 1024  ;;  %p888_p8 = scmp.lt.s32.totalorder %s1153_s5, %s886_s22 }
  0x46   : > { %424 = vmatpush1.bf16.msra.mxu0 %v755_v28  ;;  %465 = vmatpush1.bf16.msra.mxu1 %v757_v30  ;;  %v411_v5 = vand.u32 %v768_v62, %v1107_v26  ;;  %p889_p9 = scmp.lt.s32.totalorder %s887_s25, %s881_s20 }
  0x47   : > { %425 = vmatprep.subr.bf16.mxu0 %v399_v31  ;;  %466 = vmatprep.subr.bf16.mxu1 %v405_v34  ;;  %v417_v7 = vand.u32 %v770_v1, %v1107_v26  ;;  %v408_v8 = vand.u32 %v767_v3, %v1107_v26  ;;  %v414_v9 = vand.u32 %v769_v6, %v1107_v26 }
  0x48   : > { %p890_p0 = por %p889_p9, %p888_p8 }
  0x4a   : > { %426 = vmatpush1.bf16.msra.mxu0 %v396_v39  ;;  %467 = vmatpush1.bf16.msra.mxu1 %v402_v41  ;;  %p891_p2 = pnand %p890_p0, %p884_p12 }
  0x4b   : > { %501 = vmatprep.subr.bf16.mxu0 %v744_v42  ;;  %542 = vmatprep.subr.bf16.mxu1 %v746_v43 }
  0x4d   : > { %771 = vmatmul.mubr.msk.bf16.vlgmr.msra.gmra.mrb[0].mxu0 %vm388_vm1, %v219_v48  ;;  %772 = vmatmul.mubr.msk.bf16.vlgmr.msra.gmra.mrb[0].mxu1 %vm388_vm1, %v219_v48 }
  0x4e   : > { %502 = vmatpush1.bf16.msra.mxu0 %v743_v49  ;;  %543 = vmatpush1.bf16.msra.mxu1 %v745_v50 }
  0x4f   : > { %503 = vmatprep.subr.bf16.mxu0 %v752_v51  ;;  %544 = vmatprep.subr.bf16.mxu1 %v754_v52 }
  0x50   : > { %533 = vmatprep.mubr.bf16.mxu0 %v953_v0  ;;  %574 = vmatprep.mubr.bf16.mxu1 %v953_v0 }
  0x52   : > { %504 = vmatpush1.bf16.msra.mxu0 %v751_v59  ;;  %545 = vmatpush1.bf16.msra.mxu1 %v753_v60 }
  0x53   : > { %505 = vmatprep.subr.bf16.mxu0 %v760_v61  ;;  %546 = vmatprep.subr.bf16.mxu1 %v762_v63 }
  0x56   : > { %506 = vmatpush1.bf16.msra.mxu0 %v759_v2  ;;  %547 = vmatpush1.bf16.msra.mxu1 %v761_v4 }
  0x57   : > { %507 = vmatprep.subr.bf16.mxu0 %v411_v5  ;;  %548 = vmatprep.subr.bf16.mxu1 %v417_v7 }
  0x5a   : > { %508 = vmatpush1.bf16.msra.mxu0 %v408_v8  ;;  %549 = vmatpush1.bf16.msra.mxu1 %v414_v9 }
  0x5d   : > { %773 = vmatmul.mubr.msk.bf16.vlgmr.msra.gmra.mrb[4].mxu0 %vm388_vm1, %v219_v48  ;;  %774 = vmatmul.mubr.msk.bf16.vlgmr.msra.gmra.mrb[4].mxu1 %vm388_vm1, %v219_v48 }
  0xc0   : > { %v587_v0 = vpop.permute.xlu0 %586 }
  0xc4   : > { %v601_v11 = vpop.permute.xlu0 %600 }
 0x120   : > { %v453_v10 = vpop.f32.mrb[0].mxu0  ;;  %v494_v13 = vpop.f32.mrb[0].mxu1 }
 0x121   : > { %v589_v12 = vmul.f32 %v587_v0, %v453_v10  ;;  %v455_v14 = vpop.f32.mrb[1].mxu0  ;;  %v591_v15 = vmul.f32 %v587_v0, %v494_v13  ;;  %v496_v17 = vpop.f32.mrb[1].mxu1 }
 0x122   : > { %v590_v16 = vmul.f32 %v587_v0, %v455_v14  ;;  %v457_v18 = vpop.f32.mrb[2].mxu0  ;;  %v592_v19 = vmul.f32 %v587_v0, %v496_v17  ;;  %v498_v20 = vpop.f32.mrb[2].mxu1 }
 0x123   : > { %v603_v21 = vadd.f32 %v601_v11, %v589_v12  ;;  %v458_v22 = vpop.f32.mrb[3].mxu0  ;;  %v605_v24 = vadd.f32 %v601_v11, %v591_v15  ;;  %v499_v25 = vpop.f32.mrb[3].mxu1 }
 0x124   : > { %v604_v23 = vadd.f32 %v601_v11, %v590_v16  ;;  %v606_v26 = vadd.f32 %v601_v11, %v592_v19 }
 0x126   : > { %v785_v27 = vpack.c.bf16 %v604_v23, %v603_v21  ;;  %v786_v28 = vpack.c.bf16 %v606_v26, %v605_v24 }
 0x128   : > { %643 = vst [vmem:[%s215_s29] sm:$0xff] %v785_v27  ;;  %644 = vst [vmem:[%s215_s29 + $0x8] sm:$0xff] %v786_v28 }
 0x130   : > { %v535_v29 = vpop.f32.mrb[4].mxu0  ;;  %v576_v31 = vpop.f32.mrb[4].mxu1 }
 0x131   : > { %v593_v30 = vmul.f32 %v587_v0, %v535_v29  ;;  %v537_v32 = vpop.f32.mrb[5].mxu0  ;;  %v595_v33 = vmul.f32 %v587_v0, %v576_v31  ;;  %v578_v35 = vpop.f32.mrb[5].mxu1 }
 0x132   : > { %v594_v34 = vmul.f32 %v587_v0, %v537_v32  ;;  %v539_v36 = vpop.f32.mrb[6].mxu0  ;;  %v596_v38 = vmul.f32 %v587_v0, %v578_v35  ;;  %v580_v39 = vpop.f32.mrb[6].mxu1 }
 0x133   : > { %v607_v37 = vadd.f32 %v601_v11, %v593_v30  ;;  %v540_v40 = vpop.f32.mrb[7].mxu0  ;;  %v609_v41 = vadd.f32 %v601_v11, %v595_v33  ;;  %v581_v43 = vpop.f32.mrb[7].mxu1 }
 0x134   : > { %v608_v42 = vadd.f32 %v601_v11, %v594_v34  ;;  %v610_v44 = vadd.f32 %v601_v11, %v596_v38 }
 0x136   : > { %v787_v45 = vpack.c.bf16 %v608_v42, %v607_v37  ;;  %v788_v46 = vpack.c.bf16 %v610_v44, %v609_v41 }
 0x138   : > { %645 = vst [vmem:[%s215_s29 + $0x10] sm:$0xff] %v787_v45  ;;  %646 = vst [vmem:[%s215_s29 + $0x18] sm:$0xff] %v788_v46 }
 0x139   : > { %894 = shalt.err (!%p891_p2)
}
 0x13a   : > { %s895_s13 = scalar_lea.hbm %s1151_s12, 512  ;;  %s899_s10 = scalar_lea.hbm %s1198_s4, 4096 }
 0x13b   : > { %p896_p4 = scmp.ne.s32.totalorder %s1151_s12, %s895_s13  ;;  %p900_p13 = scmp.lt.u32.totalorder %s1151_s12, %s1198_s4 }
 0x13c   : > { %p901_p1 = scmp.lt.u32.totalorder %s899_s10, %s895_s13  ;;  %p903_p6 = scmp.lt.u32.totalorder %s895_s13, %s1151_s12 }
 0x13d   : > { %p897_p5 = pnand %p896_p4, %p1205_p10 }
 0x13e   : > { %p902_p3 = por %p901_p1, %p900_p13 }
 0x13f   : > { %p898_p7 = pneg %p897_p5 }
 0x140   : > { %p904_p11 = por %p903_p6, %p902_p3 }
 0x142   : > { %p905_p12 = pnand %p904_p11, %p898_p7 }
 0x144   : > { %908 = shalt.err (!%p905_p12)
}
 0x145   : > { %794 = dma.vmem_to_hbm [thread:$0]  (%p1205_p10), %s1153_s5, 512, %s1151_s12, %s648_s14  }
 0x146 PF: > { %p805_p8 = scmp.ge.s32.totalorder %s947_s18, 2  ;;  %s674_s28 = sand.u32 1, %s935_s15  }
 0x147   : > { %p1206_p9 = scmp.ne.s32.totalorder %s1202_s27, 0  ;;  %s675_s29 = scalar_lea.sflag [#allocation4], %s674_s28 }
 0x149   : > { %p801_p0 = pnand %p805_p8, %p1206_p9 }
 0x14b   : > { %930 = dma.done.wait (!%p801_p0), %s675_s29, 512  }
 0x14c   : > { %932 = vsyncadd (!%p801_p0), %s675_s29, 4294966784  ;;  %p17_p2 = scmp.ge.s32.totalorder %s1005_s21, 10   ;;  %s1207_s15 = smov %s939_s16 }
 0x14d   : > { %s1208_s16 = smov %s943_s17  ;;  %s1209_s17 = smov %s1017_s24 }
 0x14e   : > { %s1210_s18 = smov %s1005_s21  ;;  %19 = sbr.rel (!%p17_p2) target bundleno = 5 (0x5), region = 81 }
 0x155   :  { %680 = vsyncpa [#allocation3], 1 }
 0x156   :  { %682 = vsyncpa [#allocation3 + $0x1], 1 }
 0x157   :  { %683 = vsyncpa [#allocation4], 1 }
 0x158   :  { %685 = vsyncpa [#allocation4 + $0x1], 1 }

</bundles_post_ra>
